<compile_context>
chip_gen: v6e
topology: v6e:2x2x1
jax: 0.10.0
libtpu: 0.0.40
codegen_flags: <defaults>
</compile_context>

<pallas_src>
import jax
import jax.numpy as jnp
from jax.experimental import pallas as pl
from jax.experimental.pallas import tpu as pltpu

BATCH = 2
SEQ = 8
HIDDEN = 32

_INV_SQRT2 = 0.7071067811865476


def _erf(z):
    # Abramowitz & Stegun 7.1.26 rational approximation (max abs err ~1.5e-7).
    # Built only from exp / mul / add / div / abs / where — all guaranteed
    # Mosaic lowerings (no reliance on lax.erf inside the kernel).
    a1, a2, a3, a4, a5 = 0.254829592, -0.284496736, 1.421413741, -1.453152027, 1.061405429
    p = 0.3275911
    s = jnp.where(z >= 0.0, 1.0, -1.0)
    az = jnp.abs(z)
    t = 1.0 / (1.0 + p * az)
    poly = ((((a5 * t + a4) * t + a3) * t + a2) * t + a1) * t
    return s * (1.0 - poly * jnp.exp(-az * az))


def _gelu_exact(x):
    # erf-based GELU, matching transformers get_activation("gelu") / F.gelu default.
    return 0.5 * x * (1.0 + _erf(x * _INV_SQRT2))


def disc_pred_kernel(x_ref, p_ref, out_ref):
    # x_ref: (N, H)   flattened hidden states, N = B*S
    # p_ref: (H+3, H) packed params:
    #        rows [0:H] -> W1 (stored (in, out), i.e. y = x @ W1 + b1)
    #        row  H     -> b1
    #        row  H+1   -> dense_prediction weight (1, H)
    #        row  H+2   -> b2 (scalar broadcast across the row)
    h_dim = p_ref.shape[0] - 3                       # static (trace-time) int

    x = x_ref[...]                                   # (N, H) f32
    w1 = p_ref[0:h_dim, :]                           # (H, H)
    b1 = p_ref[h_dim:h_dim + 1, :]                   # (1, H)
    w2 = p_ref[h_dim + 1:h_dim + 2, :]               # (1, H)
    b2 = p_ref[h_dim + 2:h_dim + 3, 0:1]             # (1, 1)

    h = jnp.dot(x, w1, preferred_element_type=jnp.float32) + b1   # (N, H), MXU
    h = _gelu_exact(h)                                             # VPU/EUP
    # H -> 1 projection: multiply + lane reduction (no 1-wide MXU launch).
    logits = jnp.sum(h * w2, axis=-1, keepdims=True) + b2          # (N, 1)
    out_ref[...] = logits.astype(out_ref.dtype)


def pack_params(params):
    """Pack all module parameters into one (H+3, H) slab. Do this ONCE."""
    h = params["w1"].shape[0]
    return jnp.concatenate(
        [
            params["w1"],                                   # (H, H)
            params["b1"],                                   # (1, H)
            params["w2_row"],                               # (1, H)
            jnp.broadcast_to(params["b2"], (1, h)),         # (1, H)
        ],
        axis=0,
    )  # (H + 3, H)


def electra_discriminator_predictions(x, packed):
    """x: (B, S, H) float32, packed: (H+3, H). Returns (B, S) logits (squeeze(-1))."""
    B, S, H = x.shape
    N = B * S
    x_flat = x.reshape(N, H)

    out = pl.pallas_call(
        disc_pred_kernel,
        out_shape=jax.ShapeDtypeStruct((N, 1), jnp.float32),
        # No grid: single invocation, whole operands resident in VMEM.
        in_specs=[
            pl.BlockSpec(memory_space=pltpu.MemorySpace.VMEM),
            pl.BlockSpec(memory_space=pltpu.MemorySpace.VMEM),
        ],
        out_specs=pl.BlockSpec(memory_space=pltpu.MemorySpace.VMEM),
    )(x_flat, packed)
    return out.reshape(B, S)


def init_params(key, hidden):
    ks = jax.random.split(key, 4)
    scale = 0.02
    w1 = scale * jax.random.normal(ks[0], (hidden, hidden), jnp.float32)   # (in, out)
    b1 = scale * jax.random.normal(ks[1], (1, hidden), jnp.float32)
    w2_row = scale * jax.random.normal(ks[2], (1, hidden), jnp.float32)    # dense_prediction.weight (1, H)
    b2 = scale * jax.random.normal(ks[3], (1, 1), jnp.float32)             # dense_prediction.bias
    return dict(w1=w1, b1=b1, w2_row=w2_row, b2=b2)


def electra_discriminator_predictions_ref(x, p):
    """Pure-JAX reference of the PyTorch forward (eval mode, hidden_act='gelu')."""
    h = x @ p["w1"] + p["b1"]                       # (B, S, H)
    h = jax.nn.gelu(h, approximate=False)           # exact erf-GELU
    logits = jnp.einsum("bsh,h->bs", h, p["w2_row"][0]) + p["b2"][0, 0]
    return logits


if __name__ == "__main__":
    key = jax.random.PRNGKey(0)
    k_x, k_p = jax.random.split(key)
    x = jax.random.normal(k_x, (BATCH, SEQ, HIDDEN), jnp.float32)
    params = init_params(k_p, HIDDEN)
    packed = pack_params(params)    # one-time packing, not in the hot path

    out = electra_discriminator_predictions(x, packed)
    out = jax.block_until_ready(out)

    ref = electra_discriminator_predictions_ref(x, params)
    assert out.shape == (BATCH, SEQ)
    assert jnp.allclose(out, ref, atol=1e-4, rtol=1e-4), "mismatch vs reference"

    print("KERNEL_OK")
</pallas_src>

<mosaic_0001>
module attributes {stable_mosaic.version = 11 : i64} {
  func.func @disc_pred_kernel(%arg0: memref<16x32xf32, #tpu.memory_space<vmem>>, %arg1: memref<35x32xf32, #tpu.memory_space<vmem>>, %arg2: memref<16x1xf32, #tpu.memory_space<vmem>>) attributes {dimension_semantics = [], scalar_prefetch = 0 : i64, scratch_operands = 0 : i64, tpu.core_type = #tpu.core_type<tc>} {
    %c0 = arith.constant 0 : index
    %c0_0 = arith.constant 0 : index
    %0 = vector.load %arg0[%c0, %c0_0] : memref<16x32xf32, #tpu.memory_space<vmem>>, vector<16x32xf32>
    %c0_1 = arith.constant 0 : index
    %c0_2 = arith.constant 0 : index
    %1 = vector.load %arg1[%c0_1, %c0_2] : memref<35x32xf32, #tpu.memory_space<vmem>>, vector<32x32xf32>
    %c32 = arith.constant 32 : index
    %c0_3 = arith.constant 0 : index
    %2 = vector.load %arg1[%c32, %c0_3] : memref<35x32xf32, #tpu.memory_space<vmem>>, vector<1x32xf32>
    %c33 = arith.constant 33 : index
    %c0_4 = arith.constant 0 : index
    %3 = vector.load %arg1[%c33, %c0_4] : memref<35x32xf32, #tpu.memory_space<vmem>>, vector<1x32xf32>
    %c34 = arith.constant 34 : index
    %c0_5 = arith.constant 0 : index
    %4 = vector.load %arg1[%c34, %c0_5] : memref<35x32xf32, #tpu.memory_space<vmem>>, vector<1x1xf32>
    %cst = arith.constant dense<0.000000e+00> : vector<16x32xf32>
    %5 = tpu.matmul %0, %1, %cst {dimension_numbers = #tpu.dot_dimension_numbers<[1], [0], [0], [1], [0, 0, 1, 1], [], []>} : vector<16x32xf32>, vector<32x32xf32>, vector<16x32xf32> -> vector<16x32xf32>
    %6 = vector.broadcast %2 : vector<1x32xf32> to vector<16x32xf32>
    %7 = arith.addf %5, %6 : vector<16x32xf32>
    %cst_6 = arith.constant 5.000000e-01 : f32
    %8 = vector.broadcast %cst_6 : f32 to vector<16x32xf32>
    %9 = arith.mulf %8, %7 : vector<16x32xf32>
    %cst_7 = arith.constant 0.707106769 : f32
    %10 = vector.broadcast %cst_7 : f32 to vector<16x32xf32>
    %11 = arith.mulf %7, %10 : vector<16x32xf32>
    %cst_8 = arith.constant 0.000000e+00 : f32
    %12 = vector.broadcast %cst_8 : f32 to vector<16x32xf32>
    %13 = arith.cmpf oge, %11, %12 : vector<16x32xf32>
    %cst_9 = arith.constant 1.000000e+00 : f32
    %cst_10 = arith.constant -1.000000e+00 : f32
    %14 = vector.broadcast %cst_9 : f32 to vector<16x32xf32>
    %15 = vector.broadcast %cst_10 : f32 to vector<16x32xf32>
    %16 = arith.select %13, %14, %15 : vector<16x32xi1>, vector<16x32xf32>
    %17 = math.absf %11 : vector<16x32xf32>
    %cst_11 = arith.constant 0.327591091 : f32
    %18 = vector.broadcast %cst_11 : f32 to vector<16x32xf32>
    %19 = arith.mulf %18, %17 : vector<16x32xf32>
    %cst_12 = arith.constant 1.000000e+00 : f32
    %20 = vector.broadcast %cst_12 : f32 to vector<16x32xf32>
    %21 = arith.addf %20, %19 : vector<16x32xf32>
    %cst_13 = arith.constant 1.000000e+00 : f32
    %22 = vector.broadcast %cst_13 : f32 to vector<16x32xf32>
    %23 = arith.divf %22, %21 : vector<16x32xf32>
    %cst_14 = arith.constant 1.06140542 : f32
    %24 = vector.broadcast %cst_14 : f32 to vector<16x32xf32>
    %25 = arith.mulf %24, %23 : vector<16x32xf32>
    %cst_15 = arith.constant -1.45315206 : f32
    %26 = vector.broadcast %cst_15 : f32 to vector<16x32xf32>
    %27 = arith.addf %25, %26 : vector<16x32xf32>
    %28 = arith.mulf %27, %23 : vector<16x32xf32>
    %cst_16 = arith.constant 1.42141378 : f32
    %29 = vector.broadcast %cst_16 : f32 to vector<16x32xf32>
    %30 = arith.addf %28, %29 : vector<16x32xf32>
    %31 = arith.mulf %30, %23 : vector<16x32xf32>
    %cst_17 = arith.constant -0.284496725 : f32
    %32 = vector.broadcast %cst_17 : f32 to vector<16x32xf32>
    %33 = arith.addf %31, %32 : vector<16x32xf32>
    %34 = arith.mulf %33, %23 : vector<16x32xf32>
    %cst_18 = arith.constant 0.254829586 : f32
    %35 = vector.broadcast %cst_18 : f32 to vector<16x32xf32>
    %36 = arith.addf %34, %35 : vector<16x32xf32>
    %37 = arith.mulf %36, %23 : vector<16x32xf32>
    %cst_19 = arith.constant 0.000000e+00 : f32
    %38 = vector.broadcast %cst_19 : f32 to vector<16x32xf32>
    %39 = arith.subf %38, %17 : vector<16x32xf32>
    %40 = arith.mulf %39, %17 : vector<16x32xf32>
    %41 = math.exp %40 : vector<16x32xf32>
    %42 = arith.mulf %37, %41 : vector<16x32xf32>
    %cst_20 = arith.constant 1.000000e+00 : f32
    %43 = vector.broadcast %cst_20 : f32 to vector<16x32xf32>
    %44 = arith.subf %43, %42 : vector<16x32xf32>
    %45 = arith.mulf %16, %44 : vector<16x32xf32>
    %cst_21 = arith.constant 1.000000e+00 : f32
    %46 = vector.broadcast %cst_21 : f32 to vector<16x32xf32>
    %47 = arith.addf %46, %45 : vector<16x32xf32>
    %48 = arith.mulf %9, %47 : vector<16x32xf32>
    %49 = vector.broadcast %3 : vector<1x32xf32> to vector<16x32xf32>
    %50 = arith.mulf %48, %49 : vector<16x32xf32>
    %cst_22 = arith.constant dense<0.000000e+00> : vector<16xf32>
    %51 = vector.multi_reduction <add>, %50, %cst_22 [1] : vector<16x32xf32> to vector<16xf32>
    %52 = vector.shape_cast %51 : vector<16xf32> to vector<16x1xf32>
    %53 = vector.broadcast %4 : vector<1x1xf32> to vector<16x1xf32>
    %54 = arith.addf %52, %53 : vector<16x1xf32>
    %c0_23 = arith.constant 0 : index
    %c0_24 = arith.constant 0 : index
    %55 = vector.load %arg2[%c0_23, %c0_24] : memref<16x1xf32, #tpu.memory_space<vmem>>, vector<16x1xf32>
    tpu.vector_store %arg2[%c0_23, %c0_24], %54 {strides = array<i32>} : memref<16x1xf32, #tpu.memory_space<vmem>>, vector<16x1xf32>,
    return
  }
}

</mosaic_0001>

<bundles_post_ra>
// kernel: tpu_custom_call.1
= control target key start
LH: loop header
LB: loop body
LE: loop exit
PB: predicated region body
PF: predicated region fallthrough
CT: control target
= control target key end

     0   :  { %vm24_vm0 = vcmask 261120   ;;  %v216_v49 = vmov -1.0   ;;  %vm178_vm3 = vcmask 7168   ;;  %s269_s1 = inlined_call_operand.vmem [shape: f32[35,32], index: 1, kind: input, shape index: {}]   ;;  %s270_s0 = inlined_call_operand.vmem [shape: f32[16,32], index: 0, kind: input, shape index: {}]   ;;  %s271_s2 = inlined_call_operand.vmem [shape: f32[16,1], index: 2, kind: output, shape index: {}]  }
   0x1   :  { %v16_v0 = vld [vmem:[%s269_s1 + $0x18] sm:$0xff]  ;;  %v15_v1 = vld [vmem:[%s269_s1 + $0x10] sm:$0xff]  ;;  %v11_v2 = vld [vmem:[%s270_s0] sm:$0xff] }
   0x2   :  { %196 = vmatprep.subr.mxu0 %v16_v0  ;;  %v14_v3 = vld [vmem:[%s269_s1 + $0x8] sm:$0xff]  ;;  %204 = vmatprep.mubr.msk.f32.mxu0 %vm24_vm0, %v11_v2  ;;  %v13_v4 = vld [vmem:[%s269_s1] sm:$0xff] }
   0x3   :  { %197 = vmatpush3.msra.mxu0 %v16_v0  ;;  %v12_v5 = vld [vmem:[%s270_s0 + $0x8] sm:$0xff]  ;;  %v185_v6 = vld [vmem:[%s269_s1 + $0x20] ss:$0 sm:$0xff]  ;;  %v188_v62 = vld [vmem:[%s269_s1 + $0x21] ss:$0 sm:$0xff] }
   0x4   :  { %198 = vmatprep.subr.mxu0 %v15_v1 }
   0x5   :  { %199 = vmatpush3.msra.mxu0 %v15_v1 }
   0x6   :  { %200 = vmatprep.subr.mxu0 %v14_v3 }
   0x7   :  { %201 = vmatpush3.msra.mxu0 %v14_v3  ;;  %v189_v3 = vld [vmem:[%s269_s1 + $0x22] ss:$0 sm:$0xff] }
   0x8   :  { %202 = vmatprep.subr.mxu0 %v13_v4 }
   0x9   :  { %203 = vmatpush3.msra.mxu0 %v13_v4 }
   0xa   :  { %205 = vmatmul.mubr.msk.f32.vlgmr.msra.gmra.mxu0 %vm24_vm0, %v12_v5 }
  0xca   :  { %v206_v7 = vpop.f32.mrf.mxu0 }
  0xcb   :  { %v103_v8 = vadd.f32 %v206_v7, %v185_v6 }
  0xcc   :  { %v97_v9 = vpop.f32.mrf.mxu0 }
  0xcd   :  { %v109_v10 = vmul.f32 0.70710677, %v103_v8  ;;  %v98_v11 = vadd.f32 %v185_v6, %v97_v9  ;;  %v107_v57 = vmul.f32 0.5, %v103_v8 }
  0xcf   :  { %v115_v12 = vand.u32 2147483647, %v109_v10  ;;  %v108_v13 = vmul.f32 0.70710677, %v98_v11  ;;  %vm111_vm1 = vcmp.ge.f32.partialorder %v109_v10, 0.0  ;;  %v106_v58 = vmul.f32 0.5, %v98_v11 }
  0xd0   :  { %v113_v50 = vsel %vm111_vm1, 1.0, %v216_v49 }
  0xd1   :  { %v117_v14 = vmul.f32 0.3275911, %v115_v12  ;;  %v114_v15 = vand.u32 2147483647, %v108_v13  ;;  %v143_v19 = vsub.f32 0.0, %v115_v12  ;;  %vm110_vm2 = vcmp.ge.f32.partialorder %v108_v13, 0.0 }
  0xd2   :  { %v112_v54 = vsel %vm110_vm2, 1.0, %v216_v49 }
  0xd3   :  { %v119_v16 = vadd.f32 1.0, %v117_v14  ;;  %v116_v17 = vmul.f32 0.3275911, %v114_v15  ;;  %v142_v20 = vsub.f32 0.0, %v114_v15  ;;  %v145_v21 = vmul.f32 %v143_v19, %v115_v12 }
  0xd5   :  { %208 = vrcp.f32 %v119_v16  ;;  %v118_v18 = vadd.f32 1.0, %v116_v17  ;;  %v144_v23 = vmul.f32 %v142_v20, %v114_v15  ;;  %v148_v25 = vmul.f32 1.442695, %v145_v21 }
  0xd7   :  { %210 = vrcp.f32 %v118_v18  ;;  %v146_v28 = vmul.f32 1.442695, %v144_v23 }
  0xd8   :  { %212 = vpow2.f32 %v148_v25 }
  0xd9   :  { %214 = vpow2.f32 %v146_v28 }
  0xe2   :  { %v209_v22 = vpop.eup %208 }
  0xe3   :  { %v125_v24 = vmul.f32 1.0614054, %v209_v22 }
  0xe4   :  { %v211_v26 = vpop.eup %210 }
  0xe5   :  { %v127_v27 = vadd.f32 -1.4531521, %v125_v24  ;;  %v124_v29 = vmul.f32 1.0614054, %v211_v26  ;;  %v213_v43 = vpop.eup %212 }
  0xe6   :  { %v215_v47 = vpop.eup %214 }
  0xe7   :  { %v129_v30 = vmul.f32 %v209_v22, %v127_v27  ;;  %v126_v31 = vadd.f32 -1.4531521, %v124_v29 }
  0xe9   :  { %v131_v32 = vadd.f32 1.4214138, %v129_v30  ;;  %v128_v33 = vmul.f32 %v211_v26, %v126_v31 }
  0xeb   :  { %v133_v34 = vmul.f32 %v209_v22, %v131_v32  ;;  %v130_v35 = vadd.f32 1.4214138, %v128_v33 }
  0xed   :  { %v135_v36 = vadd.f32 -0.28449672, %v133_v34  ;;  %v132_v37 = vmul.f32 %v211_v26, %v130_v35 }
  0xef   :  { %v137_v38 = vmul.f32 %v209_v22, %v135_v36  ;;  %v134_v39 = vadd.f32 -0.28449672, %v132_v37 }
  0xf1   :  { %v139_v40 = vadd.f32 0.2548296, %v137_v38  ;;  %v136_v41 = vmul.f32 %v211_v26, %v134_v39 }
  0xf3   :  { %v141_v42 = vmul.f32 %v209_v22, %v139_v40  ;;  %v138_v44 = vadd.f32 0.2548296, %v136_v41 }
  0xf5   :  { %v151_v45 = vmul.f32 %v213_v43, %v141_v42  ;;  %v140_v46 = vmul.f32 %v211_v26, %v138_v44 }
  0xf7   :  { %v153_v48 = vsub.f32 1.0, %v151_v45  ;;  %v150_v51 = vmul.f32 %v215_v47, %v140_v46 }
  0xf9   :  { %v155_v52 = vmul.f32 %v153_v48, %v113_v50  ;;  %v152_v53 = vsub.f32 1.0, %v150_v51 }
  0xfb   :  { %v154_v55 = vmul.f32 %v152_v53, %v112_v54  ;;  %v157_v56 = vadd.f32 1.0, %v155_v52 }
  0xfd   :  { %v156_v59 = vadd.f32 1.0, %v154_v55  ;;  %v159_v61 = vmul.f32 %v157_v56, %v107_v57 }
  0xff   :  { %v158_v60 = vmul.f32 %v156_v59, %v106_v58  ;;  %v165_v1 = vmul.f32 %v188_v62, %v159_v61 }
 0x101   :  { %v164_v63 = vmul.f32 %v188_v62, %v158_v60  ;;  %v169_v2 = vsel %vm24_vm0, %v165_v1, 0.0 }
 0x103   :  { %v166_v0 = vsel %vm24_vm0, %v164_v63, 0.0 }
 0x104   :  { %167 = vadd.xlane.f32.xlu0 %v166_v0 }
 0x108   :  { %170 = vadd.xlane.f32.xlu0 %v169_v2 }
 0x18d   :  { %v168_v4 = vpop.xlane.xlu0 %167 }
 0x18e   :  { %v176_v5 = vadd.f32 %v189_v3, %v168_v4 }
 0x190   :  { %179 = vst.msk [vmem:[%s271_s2] sm:$0xff] %vm178_vm3, %v176_v5 }
 0x191   :  { %v171_v6 = vpop.xlane.xlu0 %170 }
 0x192   :  { %v177_v7 = vadd.f32 %v189_v3, %v171_v6 }
 0x194   :  { %180 = vst.msk [vmem:[%s271_s2 + $0x8] sm:$0xff] %vm178_vm3, %v177_v7 }

</bundles_post_ra>
